<compile_context>
chip_gen: v6e
topology: v6e:2x2x1
jax: 0.10.0
libtpu: 0.0.40
codegen_flags: <defaults>
</compile_context>

<pallas_src>
import jax
import jax.numpy as jnp
from jax.experimental import pallas as pl
from jax.experimental.pallas import tpu as pltpu

CLIP_DIM = 512
REDUCTION_FACTOR = 8
BOTTLENECK_DIM = CLIP_DIM // REDUCTION_FACTOR  # 64

_TINY_BATCH = 1024  # below this, a standalone pallas_call is overhead-dominated


def _cdiv(a, b):
    return (a + b - 1) // b


def _round_up(n, m):
    return ((n + m - 1) // m) * m


def clip_adapter_kernel(x_ref, wd_ref, bd_ref, wu_ref, bu_ref, o_ref):
    # down_proj + ReLU.  MXU operands take the weights' dtype (bf16 or f32);
    # accumulation is always f32.
    h = jnp.dot(x_ref[...].astype(wd_ref.dtype), wd_ref[...],
                preferred_element_type=jnp.float32) + bd_ref[...]
    h = jnp.maximum(h, 0.0)

    # up_proj (alpha already folded into wu/bu by the wrapper).
    up = jnp.dot(h.astype(wu_ref.dtype), wu_ref[...],
                 preferred_element_type=jnp.float32) + bu_ref[...]

    # residual + alpha*up(relu(down(x)))  — re-read x here instead of keeping
    # an f32 copy live across both matmuls (VMEM / spill pressure).
    o_ref[...] = (x_ref[...].astype(jnp.float32) + up).astype(o_ref.dtype)


def _jnp_forward(x, w_down, b_down, w_up, b_up, alpha, out_dtype):
    """Plain-XLA fallback for tiny batches (same numerics as the kernel)."""
    xf = x.astype(jnp.float32)
    h = jnp.maximum(
        jnp.dot(x.astype(w_down.dtype), w_down,
                preferred_element_type=jnp.float32)
        + b_down.astype(jnp.float32), 0.0)
    up = jnp.dot(h.astype(w_up.dtype), w_up,
                 preferred_element_type=jnp.float32) + b_up.astype(jnp.float32)
    return (xf + jnp.float32(alpha) * up).astype(out_dtype)


def clip_adapter_forward(x, w_down, b_down, w_up, b_up, alpha,
                         *, block_m=None, out_dtype=None,
                         core_parallel=False, use_pallas=None):
    """x: [B, 512]; w_down: [512, 64]; w_up: [64, 512] (transposed vs nn.Linear)."""
    B, D = x.shape
    assert D == CLIP_DIM
    if out_dtype is None:
        # bf16 in -> bf16 out (production fast path).  Pass out_dtype=jnp.float32
        # for strict parity with the PyTorch module's x.float() behaviour.
        out_dtype = x.dtype

    if use_pallas is None:
        use_pallas = B >= _TINY_BATCH
    if not use_pallas:
        return _jnp_forward(x, w_down, b_down, w_up, b_up, alpha, out_dtype)

    # ---- tile selection ----------------------------------------------------
    two_byte = jnp.dtype(x.dtype).itemsize == 2
    sub = 16 if two_byte else 8                  # sublane granularity
    if block_m is None:
        block_m = 1024 if two_byte else 512      # v5e-safe f32 default
    block_m = max(sub, (block_m // sub) * sub)

    # Aim for >= ~8 grid steps on medium batches (pipeline depth + both v7x
    # cores), never exceed block_m, and never go below one sublane group.
    tm = max(sub, min(block_m, _round_up(_cdiv(B, 8), sub)))
    if tm >= B:
        tm = B                                   # single full-extent block
    grid = (_cdiv(B, tm),)                       # partial last block is masked

    # ---- parameter prep (fold alpha into up_proj) ---------------------------
    alpha_f = jnp.asarray(alpha, jnp.float32)
    wu_scaled = (alpha_f * w_up.astype(jnp.float32)).astype(w_up.dtype)
    bu_scaled = (alpha_f * b_up.astype(jnp.float32)).reshape(1, CLIP_DIM)
    bd2 = b_down.astype(jnp.float32).reshape(1, BOTTLENECK_DIM)

    itemsize_x = jnp.dtype(x.dtype).itemsize
    itemsize_o = jnp.dtype(out_dtype).itemsize
    weight_bytes = (w_down.size * w_down.dtype.itemsize
                    + wu_scaled.size * wu_scaled.dtype.itemsize
                    + bd2.size * 4 + bu_scaled.size * 4)
    cost = pl.CostEstimate(
        flops=2 * B * (CLIP_DIM * BOTTLENECK_DIM + BOTTLENECK_DIM * CLIP_DIM),
        transcendentals=0,
        bytes_accessed=B * CLIP_DIM * (itemsize_x + itemsize_o) + weight_bytes,
    )

    dim_sem = (pltpu.CORE_PARALLEL,) if core_parallel else ("parallel",)

    out = pl.pallas_call(
        clip_adapter_kernel,
        out_shape=jax.ShapeDtypeStruct((B, CLIP_DIM), out_dtype),
        grid=grid,
        in_specs=[
            pl.BlockSpec((tm, CLIP_DIM), lambda i: (i, 0)),              # x: tiled
            pl.BlockSpec((CLIP_DIM, BOTTLENECK_DIM), lambda i: (0, 0)),  # w_down: resident
            pl.BlockSpec((1, BOTTLENECK_DIM), lambda i: (0, 0)),         # b_down: resident
            pl.BlockSpec((BOTTLENECK_DIM, CLIP_DIM), lambda i: (0, 0)),  # alpha*w_up: resident
            pl.BlockSpec((1, CLIP_DIM), lambda i: (0, 0)),               # alpha*b_up: resident
        ],
        out_specs=pl.BlockSpec((tm, CLIP_DIM), lambda i: (i, 0)),
        compiler_params=pltpu.CompilerParams(dimension_semantics=dim_sem),
        cost_estimate=cost,
    )(x, w_down, bd2, wu_scaled, bu_scaled)

    return out


def init_params(key):
    """Deterministic synthetic params matching nn.Linear shapes (stored transposed)."""
    k1, k2, k3, k4 = jax.random.split(key, 4)
    # PyTorch nn.Linear default init: U(-1/sqrt(fan_in), 1/sqrt(fan_in))
    bound_d = 1.0 / jnp.sqrt(CLIP_DIM)
    bound_u = 1.0 / jnp.sqrt(BOTTLENECK_DIM)
    w_down = jax.random.uniform(k1, (CLIP_DIM, BOTTLENECK_DIM), jnp.float32,
                                -bound_d, bound_d)
    b_down = jax.random.uniform(k2, (BOTTLENECK_DIM,), jnp.float32,
                                -bound_d, bound_d)
    w_up = jax.random.uniform(k3, (BOTTLENECK_DIM, CLIP_DIM), jnp.float32,
                              -bound_u, bound_u)
    b_up = jax.random.uniform(k4, (CLIP_DIM,), jnp.float32,
                              -bound_u, bound_u)
    alpha = jnp.float32(0.5)
    return w_down, b_down, w_up, b_up, alpha


def reference_forward(x, w_down, b_down, w_up, b_up, alpha):
    x = x.astype(jnp.float32)
    residual = x
    h = jnp.maximum(x @ w_down + b_down, 0.0)
    y = h @ w_up + b_up
    y = y + residual
    return alpha * y + (1.0 - alpha) * residual


if __name__ == "__main__":
    key = jax.random.PRNGKey(0)
    kx, kp = jax.random.split(key)
    w_down, b_down, w_up, b_up, alpha = init_params(kp)

    # ---- f32 path: exact semantics of the PyTorch module (kernel forced). ----
    batch = 8
    x = jax.random.normal(kx, (batch, CLIP_DIM), jnp.float32)
    ref = reference_forward(x, w_down, b_down, w_up, b_up, alpha)
    out = clip_adapter_forward(x, w_down, b_down, w_up, b_up, alpha,
                               use_pallas=True)
    out = jax.block_until_ready(out)
    assert out.shape == (batch, CLIP_DIM) and out.dtype == jnp.float32
    assert jnp.allclose(out, ref, atol=1e-5, rtol=1e-5), "f32 mismatch vs reference"

    # ---- non-divisible batch: partial last block is masked, no pad copy. ----
    batch2 = 20
    x2 = jax.random.normal(kx, (batch2, CLIP_DIM), jnp.float32)
    ref2 = reference_forward(x2, w_down, b_down, w_up, b_up, alpha)
    out2 = jax.block_until_ready(
        clip_adapter_forward(x2, w_down, b_down, w_up, b_up, alpha,
                             use_pallas=True))
    assert out2.shape == (batch2, CLIP_DIM)
    assert jnp.allclose(out2, ref2, atol=1e-5, rtol=1e-5), "partial-tile mismatch"

    # ---- bf16 I/O + bf16 MXU operands (memory-bound production fast path). ---
    out_bf16 = clip_adapter_forward(
        x.astype(jnp.bfloat16),
        w_down.astype(jnp.bfloat16), b_down,
        w_up.astype(jnp.bfloat16), b_up, alpha,
        use_pallas=True)
    out_bf16 = jax.block_until_ready(out_bf16)
    assert out_bf16.shape == (batch, CLIP_DIM) and out_bf16.dtype == jnp.bfloat16
    assert jnp.allclose(out_bf16.astype(jnp.float32), ref, atol=8e-2, rtol=8e-2), \
        "bf16 path diverged beyond bf16 tolerance"

    # ---- tiny-batch fallback path (plain jnp; kernel intentionally skipped). --
    out_fb = jax.block_until_ready(
        clip_adapter_forward(x, w_down, b_down, w_up, b_up, alpha))
    assert jnp.allclose(out_fb, ref, atol=1e-5, rtol=1e-5), "fallback mismatch"

    print("KERNEL_OK")
</pallas_src>

<mosaic_0001>
module attributes {stable_mosaic.version = 11 : i64} {
  func.func @clip_adapter_kernel(%arg0: i32, %arg1: memref<8x512xf32, #tpu.memory_space<vmem>>, %arg2: memref<512x64xf32, #tpu.memory_space<vmem>>, %arg3: memref<1x64xf32, #tpu.memory_space<vmem>>, %arg4: memref<64x512xf32, #tpu.memory_space<vmem>>, %arg5: memref<1x512xf32, #tpu.memory_space<vmem>>, %arg6: memref<8x512xf32, #tpu.memory_space<vmem>>) attributes {dimension_semantics = [#tpu.dimension_semantics<parallel>], iteration_bounds = array<i64: 1>, scalar_prefetch = 0 : i64, scratch_operands = 0 : i64, tpu.core_type = #tpu.core_type<tc>, window_params = [{transform_indices = @transform_0, window_bounds = array<i64: 8, 512>}, {pipeline_mode = #tpu.pipeline_mode<synchronous>, transform_indices = @transform_1, window_bounds = array<i64: 512, 64>}, {pipeline_mode = #tpu.pipeline_mode<synchronous>, transform_indices = @transform_2, window_bounds = array<i64: 1, 64>}, {pipeline_mode = #tpu.pipeline_mode<synchronous>, transform_indices = @transform_3, window_bounds = array<i64: 64, 512>}, {pipeline_mode = #tpu.pipeline_mode<synchronous>, transform_indices = @transform_4, window_bounds = array<i64: 1, 512>}, {transform_indices = @transform_5, window_bounds = array<i64: 8, 512>}]} {
    %c0 = arith.constant 0 : index
    %c0_0 = arith.constant 0 : index
    %0 = vector.load %arg1[%c0, %c0_0] : memref<8x512xf32, #tpu.memory_space<vmem>>, vector<8x512xf32>
    %c0_1 = arith.constant 0 : index
    %c0_2 = arith.constant 0 : index
    %1 = vector.load %arg2[%c0_1, %c0_2] : memref<512x64xf32, #tpu.memory_space<vmem>>, vector<512x64xf32>
    %cst = arith.constant dense<0.000000e+00> : vector<8x64xf32>
    %2 = tpu.matmul %0, %1, %cst {dimension_numbers = #tpu.dot_dimension_numbers<[1], [0], [0], [1], [0, 0, 1, 1], [], []>} : vector<8x512xf32>, vector<512x64xf32>, vector<8x64xf32> -> vector<8x64xf32>
    %c0_3 = arith.constant 0 : index
    %c0_4 = arith.constant 0 : index
    %3 = vector.load %arg3[%c0_3, %c0_4] : memref<1x64xf32, #tpu.memory_space<vmem>>, vector<1x64xf32>
    %4 = vector.broadcast %3 : vector<1x64xf32> to vector<8x64xf32>
    %5 = arith.addf %2, %4 : vector<8x64xf32>
    %cst_5 = arith.constant 0.000000e+00 : f32
    %6 = vector.broadcast %cst_5 : f32 to vector<8x64xf32>
    %7 = arith.maximumf %5, %6 : vector<8x64xf32>
    %c0_6 = arith.constant 0 : index
    %c0_7 = arith.constant 0 : index
    %8 = vector.load %arg4[%c0_6, %c0_7] : memref<64x512xf32, #tpu.memory_space<vmem>>, vector<64x512xf32>
    %cst_8 = arith.constant dense<0.000000e+00> : vector<8x512xf32>
    %9 = tpu.matmul %7, %8, %cst_8 {dimension_numbers = #tpu.dot_dimension_numbers<[1], [0], [0], [1], [0, 0, 1, 1], [], []>} : vector<8x64xf32>, vector<64x512xf32>, vector<8x512xf32> -> vector<8x512xf32>
    %c0_9 = arith.constant 0 : index
    %c0_10 = arith.constant 0 : index
    %10 = vector.load %arg5[%c0_9, %c0_10] : memref<1x512xf32, #tpu.memory_space<vmem>>, vector<1x512xf32>
    %11 = vector.broadcast %10 : vector<1x512xf32> to vector<8x512xf32>
    %12 = arith.addf %9, %11 : vector<8x512xf32>
    %c0_11 = arith.constant 0 : index
    %c0_12 = arith.constant 0 : index
    %13 = vector.load %arg1[%c0_11, %c0_12] : memref<8x512xf32, #tpu.memory_space<vmem>>, vector<8x512xf32>
    %14 = arith.addf %13, %12 : vector<8x512xf32>
    %c0_13 = arith.constant 0 : index
    %c0_14 = arith.constant 0 : index
    %15 = vector.load %arg6[%c0_13, %c0_14] : memref<8x512xf32, #tpu.memory_space<vmem>>, vector<8x512xf32>
    tpu.vector_store %arg6[%c0_13, %c0_14], %14 {strides = array<i32>} : memref<8x512xf32, #tpu.memory_space<vmem>>, vector<8x512xf32>,
    return
  }
  func.func @transform_0(%arg0: i32) -> (i32, i32) {
    %c0_i32 = arith.constant 0 : i32
    %c0_i32_0 = arith.constant 0 : i32
    return %arg0, %c0_i32 : i32, i32
  }
  func.func @transform_1(%arg0: i32) -> (i32, i32) {
    %c0_i32 = arith.constant 0 : i32
    %c0_i32_0 = arith.constant 0 : i32
    %c0_i32_1 = arith.constant 0 : i32
    return %c0_i32, %c0_i32_0 : i32, i32
  }
  func.func @transform_2(%arg0: i32) -> (i32, i32) {
    %c0_i32 = arith.constant 0 : i32
    %c0_i32_0 = arith.constant 0 : i32
    %c0_i32_1 = arith.constant 0 : i32
    return %c0_i32, %c0_i32_0 : i32, i32
  }
  func.func @transform_3(%arg0: i32) -> (i32, i32) {
    %c0_i32 = arith.constant 0 : i32
    %c0_i32_0 = arith.constant 0 : i32
    %c0_i32_1 = arith.constant 0 : i32
    return %c0_i32, %c0_i32_0 : i32, i32
  }
  func.func @transform_4(%arg0: i32) -> (i32, i32) {
    %c0_i32 = arith.constant 0 : i32
    %c0_i32_0 = arith.constant 0 : i32
    %c0_i32_1 = arith.constant 0 : i32
    return %c0_i32, %c0_i32_0 : i32, i32
  }
  func.func @transform_5(%arg0: i32) -> (i32, i32) {
    %c0_i32 = arith.constant 0 : i32
    %c0_i32_0 = arith.constant 0 : i32
    return %arg0, %c0_i32 : i32, i32
  }
}

</mosaic_0001>

<bundles_post_ra>
// kernel: tpu_custom_call.1
= control target key start
LH: loop header
LB: loop body
LE: loop exit
PB: predicated region body
PF: predicated region fallthrough
CT: control target
= control target key end

     0   :  { %s913_s0 = inlined_call_operand.vmem [shape: f32[8,512], index: 0, kind: input, shape index: {}]   ;;  %s914_s1 = inlined_call_operand.vmem [shape: f32[512,64], index: 1, kind: input, shape index: {}]   ;;  %s915_s2 = inlined_call_operand.vmem [shape: f32[1,64], index: 2, kind: input, shape index: {}]   ;;  %s916_s3 = inlined_call_operand.vmem [shape: f32[64,512], index: 3, kind: input, shape index: {}]   ;;  %s917_s4 = inlined_call_operand.vmem [shape: f32[1,512], index: 4, kind: input, shape index: {}]   ;;  %s918_s5 = inlined_call_operand.hbm [shape: f32[8,512], index: 5, kind: output, shape index: {}]  }
   0x1   :  { %v56_v0 = vld [vmem:[%s914_s1 + $0xf8] sm:$0xff]  ;;  %v55_v4 = vld [vmem:[%s914_s1 + $0xf0] sm:$0xff]  ;;  %v54_v8 = vld [vmem:[%s914_s1 + $0xe8] sm:$0xff] }
   0x2   :  { %v88_v1 = vld [vmem:[%s914_s1 + $0x1f8] sm:$0xff]  ;;  %462 = vmatprep.subr.mxu0 %v56_v0  ;;  %v87_v5 = vld [vmem:[%s914_s1 + $0x1f0] sm:$0xff]  ;;  %v86_v9 = vld [vmem:[%s914_s1 + $0x1e8] sm:$0xff] }
   0x3   :  { %v40_v2 = vld [vmem:[%s914_s1 + $0x78] sm:$0xff]  ;;  %497 = vmatprep.subr.mxu1 %v88_v1  ;;  %v39_v6 = vld [vmem:[%s914_s1 + $0x70] sm:$0xff]  ;;  %v38_v10 = vld [vmem:[%s914_s1 + $0x68] sm:$0xff] }
   0x4   :  { %v72_v3 = vld [vmem:[%s914_s1 + $0x178] sm:$0xff]  ;;  %463 = vmatpush3.msra.mxu0 %v40_v2  ;;  %v71_v7 = vld [vmem:[%s914_s1 + $0x170] sm:$0xff]  ;;  %v70_v11 = vld [vmem:[%s914_s1 + $0x168] sm:$0xff] }
   0x5   :  { %498 = vmatpush3.msra.mxu1 %v72_v3  ;;  %464 = vmatprep.subr.mxu0 %v55_v4  ;;  %v53_v12 = vld [vmem:[%s914_s1 + $0xe0] sm:$0xff]  ;;  %v52_v16 = vld [vmem:[%s914_s1 + $0xd8] sm:$0xff]  ;;  %v51_v20 = vld [vmem:[%s914_s1 + $0xd0] sm:$0xff] }
   0x6   :  { %499 = vmatprep.subr.mxu1 %v87_v5  ;;  %465 = vmatpush3.msra.mxu0 %v39_v6  ;;  %v85_v13 = vld [vmem:[%s914_s1 + $0x1e0] sm:$0xff]  ;;  %v84_v17 = vld [vmem:[%s914_s1 + $0x1d8] sm:$0xff]  ;;  %v83_v21 = vld [vmem:[%s914_s1 + $0x1d0] sm:$0xff] }
   0x7   :  { %500 = vmatpush3.msra.mxu1 %v71_v7  ;;  %466 = vmatprep.subr.mxu0 %v54_v8  ;;  %v37_v14 = vld [vmem:[%s914_s1 + $0x60] sm:$0xff]  ;;  %v36_v18 = vld [vmem:[%s914_s1 + $0x58] sm:$0xff]  ;;  %v35_v22 = vld [vmem:[%s914_s1 + $0x50] sm:$0xff] }
   0x8   :  { %501 = vmatprep.subr.mxu1 %v86_v9  ;;  %v69_v15 = vld [vmem:[%s914_s1 + $0x160] sm:$0xff]  ;;  %467 = vmatpush3.msra.mxu0 %v38_v10  ;;  %v68_v19 = vld [vmem:[%s914_s1 + $0x158] sm:$0xff]  ;;  %v67_v23 = vld [vmem:[%s914_s1 + $0x150] sm:$0xff] }
   0x9   :  { %502 = vmatpush3.msra.mxu1 %v70_v11  ;;  %468 = vmatprep.subr.mxu0 %v53_v12  ;;  %v50_v24 = vld [vmem:[%s914_s1 + $0xc8] sm:$0xff]  ;;  %v49_v28 = vld [vmem:[%s914_s1 + $0xc0] sm:$0xff]  ;;  %v48_v32 = vld [vmem:[%s914_s1 + $0xb8] sm:$0xff] }
   0xa   :  { %503 = vmatprep.subr.mxu1 %v85_v13  ;;  %469 = vmatpush3.msra.mxu0 %v37_v14  ;;  %v82_v25 = vld [vmem:[%s914_s1 + $0x1c8] sm:$0xff]  ;;  %v81_v29 = vld [vmem:[%s914_s1 + $0x1c0] sm:$0xff]  ;;  %v80_v33 = vld [vmem:[%s914_s1 + $0x1b8] sm:$0xff] }
   0xb   :  { %504 = vmatpush3.msra.mxu1 %v69_v15  ;;  %470 = vmatprep.subr.mxu0 %v52_v16  ;;  %v34_v26 = vld [vmem:[%s914_s1 + $0x48] sm:$0xff]  ;;  %v33_v30 = vld [vmem:[%s914_s1 + $0x40] sm:$0xff]  ;;  %v32_v34 = vld [vmem:[%s914_s1 + $0x38] sm:$0xff] }
   0xc   :  { %505 = vmatprep.subr.mxu1 %v84_v17  ;;  %471 = vmatpush3.msra.mxu0 %v36_v18  ;;  %v66_v27 = vld [vmem:[%s914_s1 + $0x148] sm:$0xff]  ;;  %v65_v31 = vld [vmem:[%s914_s1 + $0x140] sm:$0xff]  ;;  %v64_v35 = vld [vmem:[%s914_s1 + $0x138] sm:$0xff] }
   0xd   :  { %506 = vmatpush3.msra.mxu1 %v68_v19  ;;  %472 = vmatprep.subr.mxu0 %v51_v20  ;;  %v47_v36 = vld [vmem:[%s914_s1 + $0xb0] sm:$0xff]  ;;  %v46_v40 = vld [vmem:[%s914_s1 + $0xa8] sm:$0xff]  ;;  %v45_v44 = vld [vmem:[%s914_s1 + $0xa0] sm:$0xff] }
   0xe   :  { %507 = vmatprep.subr.mxu1 %v83_v21  ;;  %473 = vmatpush3.msra.mxu0 %v35_v22  ;;  %v79_v37 = vld [vmem:[%s914_s1 + $0x1b0] sm:$0xff]  ;;  %v78_v41 = vld [vmem:[%s914_s1 + $0x1a8] sm:$0xff]  ;;  %v77_v45 = vld [vmem:[%s914_s1 + $0x1a0] sm:$0xff] }
   0xf   :  { %508 = vmatpush3.msra.mxu1 %v67_v23  ;;  %474 = vmatprep.subr.mxu0 %v50_v24  ;;  %v31_v38 = vld [vmem:[%s914_s1 + $0x30] sm:$0xff]  ;;  %v30_v42 = vld [vmem:[%s914_s1 + $0x28] sm:$0xff]  ;;  %v29_v46 = vld [vmem:[%s914_s1 + $0x20] sm:$0xff] }
  0x10   :  { %509 = vmatprep.subr.mxu1 %v82_v25  ;;  %475 = vmatpush3.msra.mxu0 %v34_v26  ;;  %v63_v39 = vld [vmem:[%s914_s1 + $0x130] sm:$0xff]  ;;  %v62_v43 = vld [vmem:[%s914_s1 + $0x128] sm:$0xff]  ;;  %v61_v47 = vld [vmem:[%s914_s1 + $0x120] sm:$0xff] }
  0x11   :  { %510 = vmatpush3.msra.mxu1 %v66_v27  ;;  %476 = vmatprep.subr.mxu0 %v49_v28  ;;  %v44_v48 = vld [vmem:[%s914_s1 + $0x98] sm:$0xff]  ;;  %v43_v52 = vld [vmem:[%s914_s1 + $0x90] sm:$0xff]  ;;  %v42_v56 = vld [vmem:[%s914_s1 + $0x88] sm:$0xff] }
  0x12   :  { %511 = vmatprep.subr.mxu1 %v81_v29  ;;  %477 = vmatpush3.msra.mxu0 %v33_v30  ;;  %v76_v49 = vld [vmem:[%s914_s1 + $0x198] sm:$0xff]  ;;  %v75_v53 = vld [vmem:[%s914_s1 + $0x190] sm:$0xff]  ;;  %v74_v57 = vld [vmem:[%s914_s1 + $0x188] sm:$0xff] }
  0x13   :  { %512 = vmatpush3.msra.mxu1 %v65_v31  ;;  %478 = vmatprep.subr.mxu0 %v48_v32  ;;  %v28_v50 = vld [vmem:[%s914_s1 + $0x18] sm:$0xff]  ;;  %v27_v54 = vld [vmem:[%s914_s1 + $0x10] sm:$0xff] }
  0x14   :  { %513 = vmatprep.subr.mxu1 %v80_v33  ;;  %479 = vmatpush3.msra.mxu0 %v32_v34  ;;  %v60_v51 = vld [vmem:[%s914_s1 + $0x118] sm:$0xff]  ;;  %v59_v55 = vld [vmem:[%s914_s1 + $0x110] sm:$0xff] }
  0x15   :  { %514 = vmatpush3.msra.mxu1 %v64_v35  ;;  %480 = vmatprep.subr.mxu0 %v47_v36 }
  0x16   :  { %515 = vmatprep.subr.mxu1 %v79_v37  ;;  %481 = vmatpush3.msra.mxu0 %v31_v38 }
  0x17   :  { %516 = vmatpush3.msra.mxu1 %v63_v39  ;;  %482 = vmatprep.subr.mxu0 %v46_v40 }
  0x18   :  { %517 = vmatprep.subr.mxu1 %v78_v41  ;;  %483 = vmatpush3.msra.mxu0 %v30_v42 }
  0x19   :  { %518 = vmatpush3.msra.mxu1 %v62_v43  ;;  %484 = vmatprep.subr.mxu0 %v45_v44 }
  0x1a   :  { %519 = vmatprep.subr.mxu1 %v77_v45  ;;  %485 = vmatpush3.msra.mxu0 %v29_v46 }
  0x1b   :  { %520 = vmatpush3.msra.mxu1 %v61_v47  ;;  %486 = vmatprep.subr.mxu0 %v44_v48 }
  0x1c   :  { %521 = vmatprep.subr.mxu1 %v76_v49  ;;  %487 = vmatpush3.msra.mxu0 %v28_v50 }
  0x1d   :  { %522 = vmatpush3.msra.mxu1 %v60_v51 }
  0x1e   :  { %10 = vsyncpa [#allocation3], 0  ;;  %488 = vmatprep.subr.mxu0 %v43_v52  ;;  %523 = vmatprep.subr.mxu1 %v75_v53  ;;  %v26_v58 = vld [vmem:[%s914_s1 + $0x8] sm:$0xff]  ;;  %v41_v60 = vld [vmem:[%s914_s1 + $0x80] sm:$0xff]  ;;  %v556_v36 = vmov 0.0   ;;  %vm291_vm0 = vcmask 523264   ;;  %v271_v47 = vlaneseq }
  0x1f   :  { %v58_v59 = vld [vmem:[%s914_s1 + $0x108] sm:$0xff]  ;;  %489 = vmatpush3.msra.mxu0 %v27_v54  ;;  %524 = vmatpush3.msra.mxu1 %v59_v55  ;;  %v73_v61 = vld [vmem:[%s914_s1 + $0x180] sm:$0xff]  ;;  %v788_v1 = vld [vmem:[%s913_s0 + $0x18] sm:$0xff] }
  0x20   :  { %490 = vmatprep.subr.mxu0 %v42_v56  ;;  %525 = vmatprep.subr.mxu1 %v74_v57  ;;  %v25_v62 = vld [vmem:[%s914_s1] sm:$0xff]  ;;  %v780_v63 = vld [vmem:[%s913_s0 + $0x8] sm:$0xff]  ;;  %v798_v3 = vld [vmem:[%s913_s0 + $0x10] sm:$0xff]  ;;  %v272_v48 = vshrl.u32 %v271_v47, 7 }
  0x21   :  { %491 = vmatpush3.msra.mxu0 %v26_v58  ;;  %526 = vmatpush3.msra.mxu1 %v58_v59  ;;  %v57_v0 = vld [vmem:[%s914_s1 + $0x100] sm:$0xff]  ;;  %v266_v4 = vld [vmem:[%s916_s3 + $0xe8] sm:$0xff]  ;;  %v268_v5 = vld [vmem:[%s916_s3 + $0xf8] sm:$0xff] }
  0x22   :  { %492 = vmatprep.subr.mxu0 %v41_v60  ;;  %527 = vmatprep.subr.mxu1 %v73_v61  ;;  %v793_v2 = vld [vmem:[%s913_s0] sm:$0xff]  ;;  %v267_v7 = vld [vmem:[%s916_s3 + $0xf0] sm:$0xff]  ;;  %v262_v8 = vld [vmem:[%s916_s3 + $0xc8] sm:$0xff]  ;;  %v273_v49 = vsub.s32 0, %v272_v48  ;;  %v281_v50 = vsub.s32 2, %v272_v48  ;;  %v277_v52 = vsub.s32 1, %v272_v48 }
  0x23   :  { %493 = vmatpush3.msra.mxu0 %v25_v62  ;;  %160 = vmatprep.mubr.f32.mxu0 %v780_v63  ;;  %v265_v6 = vld [vmem:[%s916_s3 + $0xe0] sm:$0xff]  ;;  %v264_v9 = vld [vmem:[%s916_s3 + $0xd8] sm:$0xff]  ;;  %v263_v11 = vld [vmem:[%s916_s3 + $0xd0] sm:$0xff]  ;;  %v285_v53 = vsub.s32 3, %v272_v48 }
  0x24   :  { %528 = vmatpush3.msra.mxu1 %v57_v0  ;;  %230 = vmatprep.mubr.f32.mxu1 %v788_v1  ;;  %v261_v10 = vld [vmem:[%s916_s3 + $0xc0] sm:$0xff]  ;;  %v258_v12 = vld [vmem:[%s916_s3 + $0xa8] sm:$0xff]  ;;  %v260_v13 = vld [vmem:[%s916_s3 + $0xb8] sm:$0xff] }
  0x25   :  { %161 = vmatmul.mubr.f32.vlgmr.msra.gmra.mxu0 %v793_v2  ;;  %231 = vmatmul.mubr.f32.vlgmr.msra.gmra.mxu1 %v798_v3  ;;  %v257_v14 = vld [vmem:[%s916_s3 + $0xa0] sm:$0xff]  ;;  %v259_v15 = vld [vmem:[%s916_s3 + $0xb0] sm:$0xff]  ;;  %v254_v16 = vld [vmem:[%s916_s3 + $0x88] sm:$0xff] }
  0x26   :  { %311 = vmatprep.subr.mxu0 %v266_v4  ;;  %382 = vmatprep.subr.mxu1 %v268_v5  ;;  %v256_v17 = vld [vmem:[%s916_s3 + $0x98] sm:$0xff]  ;;  %v253_v18 = vld [vmem:[%s916_s3 + $0x80] sm:$0xff]  ;;  %v255_v19 = vld [vmem:[%s916_s3 + $0x90] sm:$0xff] }
  0x27   :  { %312 = vmatpush1.msra.mxu0 %v265_v6  ;;  %383 = vmatpush1.msra.mxu1 %v267_v7  ;;  %v250_v20 = vld [vmem:[%s916_s3 + $0x68] sm:$0xff]  ;;  %v252_v21 = vld [vmem:[%s916_s3 + $0x78] sm:$0xff]  ;;  %v249_v22 = vld [vmem:[%s916_s3 + $0x60] sm:$0xff] }
  0x28   :  { %313 = vmatprep.subr.mxu0 %v262_v8  ;;  %384 = vmatprep.subr.mxu1 %v264_v9  ;;  %v251_v23 = vld [vmem:[%s916_s3 + $0x70] sm:$0xff]  ;;  %v246_v24 = vld [vmem:[%s916_s3 + $0x48] sm:$0xff]  ;;  %v248_v25 = vld [vmem:[%s916_s3 + $0x58] sm:$0xff] }
  0x29   :  { %314 = vmatpush1.msra.mxu0 %v261_v10  ;;  %385 = vmatpush1.msra.mxu1 %v263_v11  ;;  %v245_v26 = vld [vmem:[%s916_s3 + $0x40] sm:$0xff]  ;;  %v247_v27 = vld [vmem:[%s916_s3 + $0x50] sm:$0xff]  ;;  %v242_v28 = vld [vmem:[%s916_s3 + $0x28] sm:$0xff] }
  0x2a   :  { %315 = vmatprep.subr.mxu0 %v258_v12  ;;  %386 = vmatprep.subr.mxu1 %v260_v13  ;;  %v244_v29 = vld [vmem:[%s916_s3 + $0x38] sm:$0xff]  ;;  %v241_v30 = vld [vmem:[%s916_s3 + $0x20] sm:$0xff]  ;;  %v243_v31 = vld [vmem:[%s916_s3 + $0x30] sm:$0xff] }
  0x2b   :  { %316 = vmatpush1.msra.mxu0 %v257_v14  ;;  %387 = vmatpush1.msra.mxu1 %v259_v15  ;;  %v238_v32 = vld [vmem:[%s916_s3 + $0x8] sm:$0xff]  ;;  %v240_v33 = vld [vmem:[%s916_s3 + $0x18] sm:$0xff]  ;;  %v237_v34 = vld [vmem:[%s916_s3] sm:$0xff] }
  0x2c   :  { %317 = vmatprep.subr.mxu0 %v254_v16  ;;  %388 = vmatprep.subr.mxu1 %v256_v17  ;;  %v239_v35 = vld [vmem:[%s916_s3 + $0x10] sm:$0xff]  ;;  %v459_v39 = vld [vmem:[%s915_s2] ss:$0 sm:$0xff]  ;;  %s557_s2 = smov [#allocation2]  }
  0x2d   :  { %318 = vmatpush1.msra.mxu0 %v253_v18  ;;  %389 = vmatpush1.msra.mxu1 %v255_v19  ;;  %v269_v51 = vld [vmem:[%s917_s4] sm:$0xf]  ;;  %s451_s15 = sshll.u32 %s557_s2, 4  ;;  %s452_s15 = int_to_ptr.vmem [resolvable:$true] %s451_s15 }
  0x2e   :  { %319 = vmatprep.subr.mxu0 %v250_v20  ;;  %390 = vmatprep.subr.mxu1 %v252_v21  ;;  %v274_v54 = vrot.slane %v269_v51, %v273_v49  ;;  %v282_v55 = vrot.slane %v269_v51, %v281_v50  ;;  %v278_v56 = vrot.slane %v269_v51, %v277_v52  ;;  %s534_s4 = scalar_lea.vmem %s452_s15, 512  ;;  %p539_p1 = scmp.lt.s32.totalorder %s452_s15, %s452_s15 }
  0x2f   :  { %320 = vmatpush1.msra.mxu0 %v249_v22  ;;  %391 = vmatpush1.msra.mxu1 %v251_v23  ;;  %v286_v57 = vrot.slane %v269_v51, %v285_v53  ;;  %p535_p0 = scmp.ne.s32.totalorder %s452_s15, %s534_s4  ;;  %p540_p2 = scmp.lt.s32.totalorder %s534_s4, %s534_s4 }
  0x30   :  { %321 = vmatprep.subr.mxu0 %v246_v24  ;;  %392 = vmatprep.subr.mxu1 %v248_v25 }
  0x31   :  { %322 = vmatpush1.msra.mxu0 %v245_v26  ;;  %393 = vmatpush1.msra.mxu1 %v247_v27  ;;  %p541_p3 = por %p540_p2, %p539_p1 }
  0x32   :  { %323 = vmatprep.subr.mxu0 %v242_v28  ;;  %394 = vmatprep.subr.mxu1 %v244_v29 }
  0x33   :  { %324 = vmatpush1.msra.mxu0 %v241_v30  ;;  %395 = vmatpush1.msra.mxu1 %v243_v31  ;;  %p542_p4 = pnand %p541_p3, %p535_p0 }
  0x34   :  { %325 = vmatprep.subr.mxu0 %v238_v32  ;;  %396 = vmatprep.subr.mxu1 %v240_v33 }
  0x35   :  { %326 = vmatpush1.msra.mxu0 %v237_v34  ;;  %359 = vmatprep.mubr.f32.mxu0 %v556_v36 }
  0x36   :  { %397 = vmatpush1.msra.mxu1 %v239_v35  ;;  %430 = vmatprep.mubr.f32.mxu1 %v556_v36 }
  0xe5   :  { %v494_v37 = vpop.f32.mrf.mxu0  ;;  %v529_v38 = vpop.f32.mrf.mxu1 }
  0xe7   :  { %v495_v40 = vpop.f32.mrf.mxu0  ;;  %v530_v41 = vpop.f32.mrf.mxu1 }
  0xe8   :  { %v496_v42 = vadd.f32 %v495_v40, %v494_v37  ;;  %v531_v44 = vadd.f32 %v530_v41, %v529_v38 }
  0xea   :  { %v163_v43 = vadd.f32 %v496_v42, %v459_v39 }
  0xec   :  { %v233_v45 = vadd.f32 %v531_v44, %v163_v43 }
  0xee   :  { %v236_v46 = vmax.f32 %v233_v45, 0.0 }
  0xf0   :  { %460 = vmatmul.mubr.msk.f32.vlgmr.msra.gmra.mxu0 %vm291_vm0, %v236_v46  ;;  %461 = vmatmul.mubr.msk.f32.vlgmr.msra.gmra.mxu1 %vm291_vm0, %v236_v46 }
 0x1b0   :  { %v361_v58 = vpop.f32.mrf.mxu0  ;;  %v432_v59 = vpop.f32.mrf.mxu1 }
 0x1b1   :  { %v362_v60 = vadd.f32 %v361_v58, %v274_v54  ;;  %v433_v61 = vadd.f32 %v432_v59, %v282_v55 }
 0x1b2   :  { %v363_v62 = vpop.f32.mrf.mxu0  ;;  %v434_v0 = vpop.f32.mrf.mxu1 }
 0x1b3   :  { %v437_v4 = vadd.f32 %v362_v60, %v793_v2  ;;  %v439_v5 = vadd.f32 %v433_v61, %v798_v3  ;;  %v364_v6 = vadd.f32 %v363_v62, %v278_v56  ;;  %v435_v7 = vadd.f32 %v434_v0, %v286_v57 }
 0x1b5   :  { %441 = vst [vmem:[#allocation2] sm:$0xff] %v437_v4  ;;  %443 = vst [vmem:[#allocation2 + $0x10] sm:$0xff] %v439_v5  ;;  %v438_v8 = vadd.f32 %v364_v6, %v780_v63  ;;  %v440_v9 = vadd.f32 %v435_v7, %v788_v1 }
 0x1b7   :  { %442 = vst [vmem:[#allocation2 + $0x8] sm:$0xff] %v438_v8  ;;  %444 = vst [vmem:[#allocation2 + $0x18] sm:$0xff] %v440_v9 }
 0x1b8   :  { %545 = shalt.err (!%p542_p4)
}
 0x1b9   :  { %454 = dma.vmem_to_hbm [thread:$0]  %s452_s15, 512, %s918_s5, [#allocation3]  }
 0x1ba   :  { %554 = dma.done.wait [#allocation3], 512  }
 0x1bb   :  { %555 = vsyncadd [#allocation3], 4294966784 }
 0x1bc   :  { %458 = vsyncpa [#allocation3], 1 }

</bundles_post_ra>
